<compile_context>
chip_gen: v7x
topology: tpu7x:2x2x1
jax: 0.10.0
libtpu: 0.0.40
codegen_flags: <defaults>
</compile_context>

<pallas_src>
import jax
import jax.numpy as jnp
from jax.experimental import pallas as pl
from jax.experimental.pallas import tpu as pltpu


def _round_up(a, b):
    return ((a + b - 1) // b) * b


def _spec(shape, index_map, buffer_count=None):
    """BlockSpec with an explicit buffer count (falls back to default if unsupported)."""
    if buffer_count is not None and hasattr(pl, "Buffered"):
        try:
            return pl.BlockSpec(shape, index_map, pipeline_mode=pl.Buffered(buffer_count))
        except TypeError:
            pass
    return pl.BlockSpec(shape, index_map)


def gps_head_kernel(x_ref, w1e_ref, b1_ref, w2t_ref, b2t_ref, o_ref, acc_ref):
    # Grid = (batch_tiles, k_tiles); kk is the reduction axis over C*H*W chunks.
    kk = pl.program_id(1)

    @pl.when(kk == 0)
    def _():
        acc_ref[...] = jnp.zeros_like(acc_ref)

    # Fused pool + fc1: the 1/HW of the mean is folded into w1e, so pooling plus the
    # first Linear is one (tile_b, tile_k) @ (tile_k, hidden) MXU matmul with f32 accum.
    acc_ref[...] += jnp.dot(x_ref[...], w1e_ref[...], preferred_element_type=jnp.float32)

    @pl.when(kk == pl.num_programs(1) - 1)
    def _():
        h = jnp.maximum(acc_ref[...] + b1_ref[...].astype(jnp.float32), 0.0)  # (tile_b, hidden)
        # fc2 computed directly in transposed layout -> lane-dense (n_out, tile_b) store.
        y_t = jnp.einsum(
            "oh,bh->ob",
            w2t_ref[...].astype(jnp.float32),
            h,
            preferred_element_type=jnp.float32,
        ) + b2t_ref[...].astype(jnp.float32)
        o_ref[...] = jax.nn.sigmoid(y_t).astype(o_ref.dtype)


def prepare_gps_head_params(w1, b1, w2, b2, pool_size, *,
                            weight_block_bytes=8 << 20, param_dtype=None):
    """One-time parameter prep (hoisted out of the per-call hot path).

    Folds the global-average-pool 1/pool_size into an expanded fc1 weight of shape
    (C*pool_size, hidden) so pool+fc1 becomes a single MXU matmul, picks the K tile,
    and pre-transposes fc2 for the lane-dense transposed output.
    """
    C, hidden = w1.shape
    k = C * pool_size
    w1e = jnp.repeat(w1 * (1.0 / pool_size), pool_size, axis=0)  # (C*pool_size, hidden)
    if param_dtype is not None:
        w1e = w1e.astype(param_dtype)

    itemsize = jnp.dtype(w1e.dtype).itemsize
    # K tile: keep one weight block bounded in VMEM (matters first on v7x's 64 MiB VMEM)
    # and keep the streamed x-tile row length reasonable.
    tk_cap = (weight_block_bytes // (hidden * itemsize) // 128) * 128
    tk_cap = max(128, min(16384, tk_cap))
    if k > tk_cap:
        tile_k = tk_cap
        k_pad = _round_up(k, tile_k)
        if k_pad != k:
            w1e = jnp.pad(w1e, ((0, k_pad - k), (0, 0)))  # zero rows -> zero contribution
    else:
        tile_k = k

    return {
        "w1e": w1e,                                # (k_pad, hidden)
        "b1": jnp.asarray(b1).reshape(1, hidden),  # (1, hidden)
        "w2t": jnp.asarray(w2).T,                  # (n_out, hidden), pre-transposed
        "b2t": jnp.asarray(b2).reshape(-1, 1),     # (n_out, 1)
        "tile_k": int(tile_k),
        "k": int(k),
    }


def gps_head_apply(x, params, *, max_tile_b=512, x_budget_bytes=16 << 20):
    """x: (N, C, H, W) NCHW.  params: output of prepare_gps_head_params."""
    # TODO(synk): the 3-D (N, S, D) input path of GPSHead (mean over dim 1) would use the
    # same kernel with w1_exp = tile(w1/S, (S,1)); only the 4-D path is wired up here.
    assert x.ndim == 4, "this kernel implements the 4-D (NCHW) path of GPSHead"
    N, C, H, W = x.shape
    k = C * H * W
    assert params["k"] == k, "params were prepared for a different C*H*W"

    w1e, b1, w2t, b2t = params["w1e"], params["b1"], params["w2t"], params["b2t"]
    tile_k = params["tile_k"]
    k_pad = w1e.shape[0]
    n_k = k_pad // tile_k
    hidden = w1e.shape[1]
    n_out = w2t.shape[0]
    itemsize = jnp.dtype(x.dtype).itemsize

    # ---- Batch tiling: the first-order lever (bigger tiles -> closer to HBM roofline). ----
    cap_rows = max(8, (x_budget_bytes // (2 * tile_k * itemsize) // 8) * 8)
    cap = min(max_tile_b, cap_rows)
    n8 = _round_up(N, 8)
    if n8 <= cap:
        tile_b = n8                      # whole (padded) batch in one grid step
    else:
        tile_b = (cap // 256) * 256      # 256-multiples fill the v6e/v7x MXU rows
        if tile_b == 0:
            tile_b = 128                 # keep the lane-dense out block 128-aligned
    n_pad = _round_up(N, tile_b)
    grid_b = n_pad // tile_b

    # Lane-dense flattened rows; pad batch (and K, if K-tiled) with zeros.
    x2 = x.reshape(N, k)
    if n_pad != N or k_pad != k:
        x2 = jnp.pad(x2, ((0, n_pad - N), (0, k_pad - k)))

    # ---- Explicit VMEM sizing (sized against v7x: 64 MiB physical, 32 MiB scoped default). ----
    w1e_bufs = 1 if n_k == 1 else 2
    vmem_needed = (
        2 * tile_b * tile_k * itemsize                                # double-buffered x
        + w1e_bufs * tile_k * hidden * jnp.dtype(w1e.dtype).itemsize  # fused weight block(s)
        + tile_b * hidden * 4                                         # f32 accumulator scratch
        + 2 * n_out * tile_b * 4                                      # double-buffered output
        + 4 * (2 * hidden + 2 * n_out + hidden * n_out)               # biases + fc2 weight
    )
    vmem_limit = int(min(max(vmem_needed * 3 // 2 + (2 << 20), 32 << 20), 56 << 20))

    cost = pl.CostEstimate(
        flops=int(2 * n_pad * (k_pad * hidden + hidden * n_out)),
        transcendentals=int(n_pad * n_out),
        bytes_accessed=int(
            n_pad * k_pad * itemsize
            + k_pad * hidden * jnp.dtype(w1e.dtype).itemsize
            + n_pad * n_out * 4
        ),
    )

    out_t = pl.pallas_call(
        gps_head_kernel,
        out_shape=jax.ShapeDtypeStruct((n_out, n_pad), jnp.float32),
        grid=(grid_b, n_k),
        in_specs=[
            pl.BlockSpec((tile_b, tile_k), lambda i, kk: (i, kk)),            # streamed x tile
            _spec((tile_k, hidden), lambda i, kk: (kk, 0),
                  1 if n_k == 1 else None),                                   # fused pool+fc1 weight
            _spec((1, hidden), lambda i, kk: (0, 0), 1),                      # fc1 bias
            _spec((n_out, hidden), lambda i, kk: (0, 0), 1),                  # fc2 weight (transposed)
            _spec((n_out, 1), lambda i, kk: (0, 0), 1),                       # fc2 bias (transposed)
        ],
        # Lane-dense transposed output: (n_out, tile_b) blocks, resident across the K axis.
        out_specs=pl.BlockSpec((n_out, tile_b), lambda i, kk: (0, i)),
        scratch_shapes=[pltpu.VMEM((tile_b, hidden), jnp.float32)],
        compiler_params=pltpu.CompilerParams(
            # TODO(synk): on v7x, if "parallel" alone does not split the batch axis across
            # both TensorCores, switch to pltpu.CORE_PARALLEL (or pl.core_map over a
            # tensorcore mesh) on that axis.
            dimension_semantics=("parallel", "arbitrary"),
            vmem_limit_bytes=vmem_limit,
        ),
        cost_estimate=cost,
    )(x2, w1e, b1, w2t, b2t)

    return out_t.T[:N]  # (N, n_out); the tiny wrapper transpose is negligible


def gps_head(x, w1, b1, w2, b2, **kw):
    """Convenience one-shot wrapper; prefer prepare_gps_head_params + gps_head_apply in a hot loop."""
    params = prepare_gps_head_params(w1, b1, w2, b2, pool_size=x.shape[2] * x.shape[3])
    return gps_head_apply(x, params, **kw)


def gps_head_ref(x, w1, b1, w2, b2):
    pooled = x.mean((2, 3))
    h = jnp.maximum(pooled @ w1 + b1, 0.0)
    return jax.nn.sigmoid(h @ w2 + b2)


if __name__ == "__main__":
    # Small shapes consistent with the module: batch=2, channels=4, spatial=16, hidden=32.
    N, C, H, W = 2, 4, 16, 16
    hidden_dim = 32

    key = jax.random.PRNGKey(0)
    kx, kw1, kb1, kw2, kb2 = jax.random.split(key, 5)

    x = jax.random.normal(kx, (N, C, H, W), dtype=jnp.float32)

    # Deterministic parameter init (PyTorch-style uniform(-1/sqrt(fan_in), 1/sqrt(fan_in))).
    bound1 = 1.0 / jnp.sqrt(jnp.float32(C))
    w1 = jax.random.uniform(kw1, (C, hidden_dim), jnp.float32, -bound1, bound1)
    b1 = jax.random.uniform(kb1, (hidden_dim,), jnp.float32, -bound1, bound1)
    bound2 = 1.0 / jnp.sqrt(jnp.float32(hidden_dim))
    w2 = jax.random.uniform(kw2, (hidden_dim, 2), jnp.float32, -bound2, bound2)
    b2 = jax.random.uniform(kb2, (2,), jnp.float32, -bound2, bound2)

    # One-time parameter prep (fused pool+fc1 weight) hoisted out of the per-call hot path.
    params = prepare_gps_head_params(w1, b1, w2, b2, pool_size=H * W)

    out = gps_head_apply(x, params)
    out = jax.block_until_ready(out)

    ref = gps_head_ref(x, w1, b1, w2, b2)
    assert out.shape == (N, 2)
    assert jnp.allclose(out, ref, atol=1e-5, rtol=1e-5), (out, ref)

    print("KERNEL_OK")
</pallas_src>

<mosaic_0001>
module attributes {stable_mosaic.version = 11 : i64} {
  func.func @gps_head_kernel(%arg0: i32, %arg1: i32, %arg2: memref<8x1024xf32, #tpu.memory_space<vmem>>, %arg3: memref<1024x32xf32, #tpu.memory_space<vmem>>, %arg4: memref<1x32xf32, #tpu.memory_space<vmem>>, %arg5: memref<2x32xf32, #tpu.memory_space<vmem>>, %arg6: memref<2x1xf32, #tpu.memory_space<vmem>>, %arg7: memref<2x8xf32, #tpu.memory_space<vmem>>, %arg8: memref<8x32xf32, #tpu.memory_space<vmem>>) attributes {dimension_semantics = [#tpu.dimension_semantics<parallel>, #tpu.dimension_semantics<arbitrary>], iteration_bounds = array<i64: 1, 1>, scalar_prefetch = 0 : i64, scratch_operands = 1 : i64, tpu.core_type = #tpu.core_type<tc>, window_params = [{transform_indices = @transform_0, window_bounds = array<i64: 8, 1024>}, {pipeline_mode = #tpu.pipeline_mode<synchronous>, transform_indices = @transform_1, window_bounds = array<i64: 1024, 32>}, {pipeline_mode = #tpu.pipeline_mode<synchronous>, transform_indices = @transform_2, window_bounds = array<i64: 1, 32>}, {pipeline_mode = #tpu.pipeline_mode<synchronous>, transform_indices = @transform_3, window_bounds = array<i64: 2, 32>}, {pipeline_mode = #tpu.pipeline_mode<synchronous>, transform_indices = @transform_4, window_bounds = array<i64: 2, 1>}, {transform_indices = @transform_5, window_bounds = array<i64: 2, 8>}]} {
    %c0_i32 = arith.constant 0 : i32
    %0 = arith.cmpi eq, %arg1, %c0_i32 : i32
    %1 = arith.extui %0 : i1 to i32
    %c0_i32_0 = arith.constant 0 : i32
    %2 = arith.cmpi ne, %1, %c0_i32_0 : i32
    scf.if %2 {
      %cst_10 = arith.constant 0.000000e+00 : f32
      %12 = vector.broadcast %cst_10 : f32 to vector<8x32xf32>
      %c0_11 = arith.constant 0 : index
      %c0_12 = arith.constant 0 : index
      %13 = vector.load %arg8[%c0_11, %c0_12] : memref<8x32xf32, #tpu.memory_space<vmem>>, vector<8x32xf32>
      tpu.vector_store %arg8[%c0_11, %c0_12], %12 {strides = array<i32>} : memref<8x32xf32, #tpu.memory_space<vmem>>, vector<8x32xf32>,
    } else {
    }
    %c0 = arith.constant 0 : index
    %c0_1 = arith.constant 0 : index
    %3 = vector.load %arg8[%c0, %c0_1] : memref<8x32xf32, #tpu.memory_space<vmem>>, vector<8x32xf32>
    %c0_2 = arith.constant 0 : index
    %c0_3 = arith.constant 0 : index
    %4 = vector.load %arg2[%c0_2, %c0_3] : memref<8x1024xf32, #tpu.memory_space<vmem>>, vector<8x1024xf32>
    %c0_4 = arith.constant 0 : index
    %c0_5 = arith.constant 0 : index
    %5 = vector.load %arg3[%c0_4, %c0_5] : memref<1024x32xf32, #tpu.memory_space<vmem>>, vector<1024x32xf32>
    %cst = arith.constant dense<0.000000e+00> : vector<8x32xf32>
    %6 = tpu.matmul %4, %5, %cst {dimension_numbers = #tpu.dot_dimension_numbers<[1], [0], [0], [1], [0, 0, 1, 1], [], []>} : vector<8x1024xf32>, vector<1024x32xf32>, vector<8x32xf32> -> vector<8x32xf32>
    %7 = arith.addf %3, %6 : vector<8x32xf32>
    %c0_6 = arith.constant 0 : index
    %c0_7 = arith.constant 0 : index
    %8 = vector.load %arg8[%c0_6, %c0_7] : memref<8x32xf32, #tpu.memory_space<vmem>>, vector<8x32xf32>
    tpu.vector_store %arg8[%c0_6, %c0_7], %7 {strides = array<i32>} : memref<8x32xf32, #tpu.memory_space<vmem>>, vector<8x32xf32>,
    %c0_i32_8 = arith.constant 0 : i32
    %9 = arith.cmpi eq, %arg1, %c0_i32_8 : i32
    %10 = arith.extui %9 : i1 to i32
    %c0_i32_9 = arith.constant 0 : i32
    %11 = arith.cmpi ne, %10, %c0_i32_9 : i32
    scf.if %11 {
      %c0_10 = arith.constant 0 : index
      %c0_11 = arith.constant 0 : index
      %12 = vector.load %arg8[%c0_10, %c0_11] : memref<8x32xf32, #tpu.memory_space<vmem>>, vector<8x32xf32>
      %c0_12 = arith.constant 0 : index
      %c0_13 = arith.constant 0 : index
      %13 = vector.load %arg4[%c0_12, %c0_13] : memref<1x32xf32, #tpu.memory_space<vmem>>, vector<1x32xf32>
      %14 = vector.broadcast %13 : vector<1x32xf32> to vector<8x32xf32>
      %15 = arith.addf %12, %14 : vector<8x32xf32>
      %cst_14 = arith.constant 0.000000e+00 : f32
      %16 = vector.broadcast %cst_14 : f32 to vector<8x32xf32>
      %17 = arith.maximumf %15, %16 : vector<8x32xf32>
      %c0_15 = arith.constant 0 : index
      %c0_16 = arith.constant 0 : index
      %18 = vector.load %arg5[%c0_15, %c0_16] : memref<2x32xf32, #tpu.memory_space<vmem>>, vector<2x32xf32>
      "tpu.trace_start"() <{level = 10 : i32, message = "oh,bh->ob"}> : () -> ()
      %cst_17 = arith.constant dense<0.000000e+00> : vector<2x8xf32>
      %19 = tpu.matmul %18, %17, %cst_17 {dimension_numbers = #tpu.dot_dimension_numbers<[1], [1], [0], [0], [0, 0, 1, 0], [], []>} : vector<2x32xf32>, vector<8x32xf32>, vector<2x8xf32> -> vector<2x8xf32>
      "tpu.trace_stop"() : () -> ()
      %c0_18 = arith.constant 0 : index
      %c0_19 = arith.constant 0 : index
      %20 = vector.load %arg6[%c0_18, %c0_19] : memref<2x1xf32, #tpu.memory_space<vmem>>, vector<2x1xf32>
      %21 = vector.broadcast %20 : vector<2x1xf32> to vector<2x8xf32>
      %22 = arith.addf %19, %21 : vector<2x8xf32>
      %23 = arith.negf %22 : vector<2x8xf32>
      %24 = math.exp %23 : vector<2x8xf32>
      %cst_20 = arith.constant 1.000000e+00 : f32
      %25 = vector.broadcast %cst_20 : f32 to vector<2x8xf32>
      %26 = arith.addf %25, %24 : vector<2x8xf32>
      %27 = arith.divf %25, %26 : vector<2x8xf32>
      %c0_21 = arith.constant 0 : index
      %c0_22 = arith.constant 0 : index
      %28 = vector.load %arg7[%c0_21, %c0_22] : memref<2x8xf32, #tpu.memory_space<vmem>>, vector<2x8xf32>
      tpu.vector_store %arg7[%c0_21, %c0_22], %27 {strides = array<i32>} : memref<2x8xf32, #tpu.memory_space<vmem>>, vector<2x8xf32>,
    } else {
    }
    return
  }
  func.func @transform_0(%arg0: i32, %arg1: i32) -> (i32, i32) {
    %c0_i32 = arith.constant 0 : i32
    return %arg0, %arg1 : i32, i32
  }
  func.func @transform_1(%arg0: i32, %arg1: i32) -> (i32, i32) {
    %c0_i32 = arith.constant 0 : i32
    %c0_i32_0 = arith.constant 0 : i32
    return %arg1, %c0_i32 : i32, i32
  }
  func.func @transform_2(%arg0: i32, %arg1: i32) -> (i32, i32) {
    %c0_i32 = arith.constant 0 : i32
    %c0_i32_0 = arith.constant 0 : i32
    %c0_i32_1 = arith.constant 0 : i32
    return %c0_i32, %c0_i32_0 : i32, i32
  }
  func.func @transform_3(%arg0: i32, %arg1: i32) -> (i32, i32) {
    %c0_i32 = arith.constant 0 : i32
    %c0_i32_0 = arith.constant 0 : i32
    %c0_i32_1 = arith.constant 0 : i32
    return %c0_i32, %c0_i32_0 : i32, i32
  }
  func.func @transform_4(%arg0: i32, %arg1: i32) -> (i32, i32) {
    %c0_i32 = arith.constant 0 : i32
    %c0_i32_0 = arith.constant 0 : i32
    %c0_i32_1 = arith.constant 0 : i32
    return %c0_i32, %c0_i32_0 : i32, i32
  }
  func.func @transform_5(%arg0: i32, %arg1: i32) -> (i32, i32) {
    %c0_i32 = arith.constant 0 : i32
    %c0_i32_0 = arith.constant 0 : i32
    return %c0_i32, %arg0 : i32, i32
  }
}

</mosaic_0001>

<bundles_post_ra>
// kernel: tpu_custom_call.1
= control target key start
LH: loop header
LB: loop body
LE: loop exit
PB: predicated region body
PF: predicated region fallthrough
CT: control target
= control target key end

     0   :  { %s1344_s0 = inlined_call_operand.vmem [shape: f32[8,1024], index: 0, kind: input, shape index: {}]   ;;  %s1345_s1 = inlined_call_operand.vmem [shape: f32[1024,32], index: 1, kind: input, shape index: {}]   ;;  %s1346_s2 = inlined_call_operand.vmem [shape: f32[1,32], index: 2, kind: input, shape index: {}]   ;;  %s1347_s3 = inlined_call_operand.vmem [shape: f32[2,32], index: 3, kind: input, shape index: {}]   ;;  %s1348_s4 = inlined_call_operand.vmem [shape: f32[2,1], index: 4, kind: input, shape index: {}]   ;;  %s1349_s5 = inlined_call_operand.hbm [shape: f32[2,8], index: 5, kind: output, shape index: {}]  }
   0x1   :  { %v52_v0 = vld [vmem:[%s1345_s1 + $0x80] sm:$0xff]  ;;  %v53_v1 = vld [vmem:[%s1345_s1 + $0x88] sm:$0xff]  ;;  %v54_v11 = vld [vmem:[%s1345_s1 + $0x90] sm:$0xff] }
   0x2   :  { %v84_v2 = vld [vmem:[%s1345_s1 + $0x180] sm:$0xff]  ;;  %v716_v3 = vpack.c.bf16 %v53_v1, %v52_v0  ;;  %v85_v4 = vld [vmem:[%s1345_s1 + $0x188] sm:$0xff]  ;;  %v55_v13 = vld [vmem:[%s1345_s1 + $0x98] sm:$0xff] }
   0x3   :  { %v36_v5 = vld [vmem:[%s1345_s1] sm:$0xff]  ;;  %v37_v6 = vld [vmem:[%s1345_s1 + $0x8] sm:$0xff]  ;;  %v748_v7 = vpack.c.bf16 %v85_v4, %v84_v2  ;;  %v86_v14 = vld [vmem:[%s1345_s1 + $0x190] sm:$0xff]  ;;  %v720_v16 = vpack.c.bf16 %v55_v13, %v54_v11 }
   0x4   :  { %v718_v8 = vpack.c.bf16 %v37_v6, %v36_v5  ;;  %v68_v9 = vld [vmem:[%s1345_s1 + $0x100] sm:$0xff]  ;;  %v69_v10 = vld [vmem:[%s1345_s1 + $0x108] sm:$0xff]  ;;  %717 = vmatprep.subr.bf16.mxu0 %v716_v3  ;;  %v87_v15 = vld [vmem:[%s1345_s1 + $0x198] sm:$0xff] }
   0x5   :  { %v750_v12 = vpack.c.bf16 %v69_v10, %v68_v9  ;;  %749 = vmatprep.subr.bf16.mxu1 %v748_v7  ;;  %v752_v17 = vpack.c.bf16 %v87_v15, %v86_v14  ;;  %v38_v18 = vld [vmem:[%s1345_s1 + $0x10] sm:$0xff]  ;;  %v39_v19 = vld [vmem:[%s1345_s1 + $0x18] sm:$0xff]  ;;  %v56_v23 = vld [vmem:[%s1345_s1 + $0xa0] sm:$0xff] }
   0x6   :  { %719 = vmatpush3.bf16.msra.mxu0 %v718_v8  ;;  %v70_v20 = vld [vmem:[%s1345_s1 + $0x110] sm:$0xff]  ;;  %v722_v21 = vpack.c.bf16 %v39_v19, %v38_v18  ;;  %v71_v22 = vld [vmem:[%s1345_s1 + $0x118] sm:$0xff]  ;;  %v57_v24 = vld [vmem:[%s1345_s1 + $0xa8] sm:$0xff] }
   0x7   :  { %751 = vmatpush3.bf16.msra.mxu1 %v750_v12  ;;  %721 = vmatprep.subr.bf16.mxu0 %v720_v16  ;;  %v754_v25 = vpack.c.bf16 %v71_v22, %v70_v20  ;;  %v724_v26 = vpack.c.bf16 %v57_v24, %v56_v23  ;;  %v88_v27 = vld [vmem:[%s1345_s1 + $0x1a0] sm:$0xff]  ;;  %v89_v28 = vld [vmem:[%s1345_s1 + $0x1a8] sm:$0xff]  ;;  %v58_v35 = vld [vmem:[%s1345_s1 + $0xb0] sm:$0xff] }
   0x8   :  { %753 = vmatprep.subr.bf16.mxu1 %v752_v17  ;;  %v40_v29 = vld [vmem:[%s1345_s1 + $0x20] sm:$0xff]  ;;  %v756_v30 = vpack.c.bf16 %v89_v28, %v88_v27  ;;  %v41_v31 = vld [vmem:[%s1345_s1 + $0x28] sm:$0xff]  ;;  %v59_v36 = vld [vmem:[%s1345_s1 + $0xb8] sm:$0xff] }
   0x9   :  { %v72_v32 = vld [vmem:[%s1345_s1 + $0x120] sm:$0xff]  ;;  %v73_v33 = vld [vmem:[%s1345_s1 + $0x128] sm:$0xff]  ;;  %v726_v34 = vpack.c.bf16 %v41_v31, %v40_v29  ;;  %v90_v37 = vld [vmem:[%s1345_s1 + $0x1b0] sm:$0xff]  ;;  %v728_v39 = vpack.c.bf16 %v59_v36, %v58_v35 }
   0xa   :  { %723 = vmatpush3.bf16.msra.mxu0 %v722_v21  ;;  %v758_v38 = vpack.c.bf16 %v73_v33, %v72_v32  ;;  %v91_v40 = vld [vmem:[%s1345_s1 + $0x1b8] sm:$0xff]  ;;  %v42_v41 = vld [vmem:[%s1345_s1 + $0x30] sm:$0xff]  ;;  %v60_v46 = vld [vmem:[%s1345_s1 + $0xc0] sm:$0xff] }
   0xb   :  { %755 = vmatpush3.bf16.msra.mxu1 %v754_v25  ;;  %725 = vmatprep.subr.bf16.mxu0 %v724_v26  ;;  %v43_v42 = vld [vmem:[%s1345_s1 + $0x38] sm:$0xff]  ;;  %v760_v43 = vpack.c.bf16 %v91_v40, %v90_v37  ;;  %v74_v44 = vld [vmem:[%s1345_s1 + $0x130] sm:$0xff]  ;;  %v61_v47 = vld [vmem:[%s1345_s1 + $0xc8] sm:$0xff] }
   0xc   :  { %757 = vmatprep.subr.bf16.mxu1 %v756_v30  ;;  %v75_v45 = vld [vmem:[%s1345_s1 + $0x138] sm:$0xff]  ;;  %v92_v48 = vld [vmem:[%s1345_s1 + $0x1c0] sm:$0xff]  ;;  %v93_v49 = vld [vmem:[%s1345_s1 + $0x1c8] sm:$0xff]  ;;  %v730_v50 = vpack.c.bf16 %v43_v42, %v42_v41  ;;  %v732_v52 = vpack.c.bf16 %v61_v47, %v60_v46 }
   0xd   :  { %v762_v51 = vpack.c.bf16 %v75_v45, %v74_v44  ;;  %v44_v53 = vld [vmem:[%s1345_s1 + $0x40] sm:$0xff]  ;;  %v45_v54 = vld [vmem:[%s1345_s1 + $0x48] sm:$0xff]  ;;  %v764_v56 = vpack.c.bf16 %v93_v49, %v92_v48  ;;  %v62_v58 = vld [vmem:[%s1345_s1 + $0xd0] sm:$0xff] }
   0xe   :  { %727 = vmatpush3.bf16.msra.mxu0 %v726_v34  ;;  %v76_v55 = vld [vmem:[%s1345_s1 + $0x140] sm:$0xff]  ;;  %v77_v57 = vld [vmem:[%s1345_s1 + $0x148] sm:$0xff]  ;;  %v63_v59 = vld [vmem:[%s1345_s1 + $0xd8] sm:$0xff]  ;;  %v734_v62 = vpack.c.bf16 %v45_v54, %v44_v53 }
   0xf   :  { %759 = vmatpush3.bf16.msra.mxu1 %v758_v38  ;;  %729 = vmatprep.subr.bf16.mxu0 %v728_v39  ;;  %v94_v60 = vld [vmem:[%s1345_s1 + $0x1d0] sm:$0xff]  ;;  %v95_v61 = vld [vmem:[%s1345_s1 + $0x1d8] sm:$0xff]  ;;  %v766_v63 = vpack.c.bf16 %v77_v57, %v76_v55  ;;  %v736_v0 = vpack.c.bf16 %v63_v59, %v62_v58  ;;  %v64_v6 = vld [vmem:[%s1345_s1 + $0xe0] sm:$0xff] }
  0x10   :  { %761 = vmatprep.subr.bf16.mxu1 %v760_v43  ;;  %v46_v1 = vld [vmem:[%s1345_s1 + $0x50] sm:$0xff]  ;;  %v47_v2 = vld [vmem:[%s1345_s1 + $0x58] sm:$0xff]  ;;  %v768_v4 = vpack.c.bf16 %v95_v61, %v94_v60  ;;  %v65_v7 = vld [vmem:[%s1345_s1 + $0xe8] sm:$0xff] }
  0x11   :  { %v78_v3 = vld [vmem:[%s1345_s1 + $0x150] sm:$0xff]  ;;  %v79_v5 = vld [vmem:[%s1345_s1 + $0x158] sm:$0xff]  ;;  %v96_v8 = vld [vmem:[%s1345_s1 + $0x1e0] sm:$0xff]  ;;  %v738_v10 = vpack.c.bf16 %v47_v2, %v46_v1  ;;  %v740_v14 = vpack.c.bf16 %v65_v7, %v64_v6 }
  0x12   :  { %731 = vmatpush3.bf16.msra.mxu0 %v730_v50  ;;  %v97_v9 = vld [vmem:[%s1345_s1 + $0x1e8] sm:$0xff]  ;;  %v48_v11 = vld [vmem:[%s1345_s1 + $0x60] sm:$0xff]  ;;  %v770_v13 = vpack.c.bf16 %v79_v5, %v78_v3  ;;  %v31_v17 = vld [vmem:[%s1344_s0 + $0x18] sm:$0xff] }
  0x13   :  { %763 = vmatpush3.bf16.msra.mxu1 %v762_v51  ;;  %733 = vmatprep.subr.bf16.mxu0 %v732_v52  ;;  %v49_v12 = vld [vmem:[%s1345_s1 + $0x68] sm:$0xff]  ;;  %v80_v15 = vld [vmem:[%s1345_s1 + $0x160] sm:$0xff]  ;;  %v772_v18 = vpack.c.bf16 %v97_v9, %v96_v8  ;;  %v66_v20 = vld [vmem:[%s1345_s1 + $0xf0] sm:$0xff] }
  0x14   :  { %765 = vmatprep.subr.bf16.mxu1 %v764_v56  ;;  %v29_v16 = vld [vmem:[%s1344_s0 + $0x8] sm:$0xff]  ;;  %v67_v21 = vld [vmem:[%s1345_s1 + $0xf8] sm:$0xff]  ;;  %v98_v22 = vld [vmem:[%s1345_s1 + $0x1f0] sm:$0xff]  ;;  %298 = vmatprep.mubr.f32.mxu1 %v31_v17  ;;  %v742_v24 = vpack.c.bf16 %v49_v12, %v48_v11 }
  0x15   :  { %v81_v19 = vld [vmem:[%s1345_s1 + $0x168] sm:$0xff]  ;;  %228 = vmatprep.mubr.f32.mxu0 %v29_v16  ;;  %v99_v23 = vld [vmem:[%s1345_s1 + $0x1f8] sm:$0xff]  ;;  %v744_v26 = vpack.c.bf16 %v67_v21, %v66_v20  ;;  %v50_v27 = vld [vmem:[%s1345_s1 + $0x70] sm:$0xff] }
  0x16   :  { %735 = vmatpush3.bf16.msra.mxu0 %v734_v62  ;;  %v774_v25 = vpack.c.bf16 %v81_v19, %v80_v15  ;;  %v51_v28 = vld [vmem:[%s1345_s1 + $0x78] sm:$0xff]  ;;  %v82_v29 = vld [vmem:[%s1345_s1 + $0x170] sm:$0xff]  ;;  %v776_v30 = vpack.c.bf16 %v99_v23, %v98_v22  ;;  %v116_v32 = vld [vmem:[%s1345_s1 + $0x280] sm:$0xff] }
  0x17   :  { %767 = vmatpush3.bf16.msra.mxu1 %v766_v63  ;;  %737 = vmatprep.subr.bf16.mxu0 %v736_v0  ;;  %v83_v31 = vld [vmem:[%s1345_s1 + $0x178] sm:$0xff]  ;;  %v117_v33 = vld [vmem:[%s1345_s1 + $0x288] sm:$0xff]  ;;  %v148_v34 = vld [vmem:[%s1345_s1 + $0x380] sm:$0xff]  ;;  %v746_v36 = vpack.c.bf16 %v51_v28, %v50_v27 }
  0x18   :  { %769 = vmatprep.subr.bf16.mxu1 %v768_v4  ;;  %v149_v35 = vld [vmem:[%s1345_s1 + $0x388] sm:$0xff]  ;;  %v778_v37 = vpack.c.bf16 %v83_v31, %v82_v29  ;;  %v780_v38 = vpack.c.bf16 %v117_v33, %v116_v32  ;;  %v100_v39 = vld [vmem:[%s1345_s1 + $0x200] sm:$0xff]  ;;  %v118_v44 = vld [vmem:[%s1345_s1 + $0x290] sm:$0xff] }
  0x19   :  { %v101_v40 = vld [vmem:[%s1345_s1 + $0x208] sm:$0xff]  ;;  %v132_v41 = vld [vmem:[%s1345_s1 + $0x300] sm:$0xff]  ;;  %v812_v42 = vpack.c.bf16 %v149_v35, %v148_v34  ;;  %v119_v45 = vld [vmem:[%s1345_s1 + $0x298] sm:$0xff] }
  0x1a   :  { %739 = vmatpush3.bf16.msra.mxu0 %v738_v10  ;;  %v133_v43 = vld [vmem:[%s1345_s1 + $0x308] sm:$0xff]  ;;  %v150_v46 = vld [vmem:[%s1345_s1 + $0x390] sm:$0xff]  ;;  %v151_v47 = vld [vmem:[%s1345_s1 + $0x398] sm:$0xff]  ;;  %v782_v50 = vpack.c.bf16 %v101_v40, %v100_v39  ;;  %v784_v52 = vpack.c.bf16 %v119_v45, %v118_v44 }
  0x1b   :  { %771 = vmatpush3.bf16.msra.mxu1 %v770_v13  ;;  %741 = vmatprep.subr.bf16.mxu0 %v740_v14  ;;  %v28_v48 = vld [vmem:[%s1344_s0] sm:$0xff]  ;;  %v30_v49 = vld [vmem:[%s1344_s0 + $0x10] sm:$0xff]  ;;  %v814_v51 = vpack.c.bf16 %v133_v43, %v132_v41  ;;  %v103_v54 = vld [vmem:[%s1345_s1 + $0x218] sm:$0xff]  ;;  %v816_v56 = vpack.c.bf16 %v151_v47, %v150_v46 }
  0x1c   :  { %773 = vmatprep.subr.bf16.mxu1 %v772_v18  ;;  %v102_v53 = vld [vmem:[%s1345_s1 + $0x210] sm:$0xff]  ;;  %v135_v57 = vld [vmem:[%s1345_s1 + $0x318] sm:$0xff]  ;;  %v120_v58 = vld [vmem:[%s1345_s1 + $0x2a0] sm:$0xff] }
  0x1d   :  { %v134_v55 = vld [vmem:[%s1345_s1 + $0x310] sm:$0xff]  ;;  %v121_v59 = vld [vmem:[%s1345_s1 + $0x2a8] sm:$0xff]  ;;  %v152_v60 = vld [vmem:[%s1345_s1 + $0x3a0] sm:$0xff]  ;;  %v786_v62 = vpack.c.bf16 %v103_v54, %v102_v53 }
  0x1e   :  { %743 = vmatpush3.bf16.msra.mxu0 %v742_v24  ;;  %v153_v61 = vld [vmem:[%s1345_s1 + $0x3a8] sm:$0xff]  ;;  %v818_v63 = vpack.c.bf16 %v135_v57, %v134_v55  ;;  %v788_v0 = vpack.c.bf16 %v121_v59, %v120_v58  ;;  %v104_v1 = vld [vmem:[%s1345_s1 + $0x220] sm:$0xff]  ;;  %v122_v6 = vld [vmem:[%s1345_s1 + $0x2b0] sm:$0xff] }
  0x1f   :  { %775 = vmatpush3.bf16.msra.mxu1 %v774_v25  ;;  %745 = vmatprep.subr.bf16.mxu0 %v744_v26  ;;  %v105_v2 = vld [vmem:[%s1345_s1 + $0x228] sm:$0xff]  ;;  %v136_v3 = vld [vmem:[%s1345_s1 + $0x320] sm:$0xff]  ;;  %v820_v4 = vpack.c.bf16 %v153_v61, %v152_v60  ;;  %v123_v7 = vld [vmem:[%s1345_s1 + $0x2b8] sm:$0xff] }
  0x20   :  { %777 = vmatprep.subr.bf16.mxu1 %v776_v30  ;;  %v137_v5 = vld [vmem:[%s1345_s1 + $0x328] sm:$0xff]  ;;  %v154_v8 = vld [vmem:[%s1345_s1 + $0x3b0] sm:$0xff]  ;;  %v155_v9 = vld [vmem:[%s1345_s1 + $0x3b8] sm:$0xff]  ;;  %v790_v10 = vpack.c.bf16 %v105_v2, %v104_v1  ;;  %v792_v12 = vpack.c.bf16 %v123_v7, %v122_v6 }
  0x21   :  { %v822_v11 = vpack.c.bf16 %v137_v5, %v136_v3  ;;  %v106_v13 = vld [vmem:[%s1345_s1 + $0x230] sm:$0xff]  ;;  %v107_v14 = vld [vmem:[%s1345_s1 + $0x238] sm:$0xff]  ;;  %v824_v16 = vpack.c.bf16 %v155_v9, %v154_v8  ;;  %v124_v18 = vld [vmem:[%s1345_s1 + $0x2c0] sm:$0xff] }
  0x22   :  { %747 = vmatpush3.bf16.msra.mxu0 %v746_v36  ;;  %v138_v15 = vld [vmem:[%s1345_s1 + $0x330] sm:$0xff]  ;;  %v139_v17 = vld [vmem:[%s1345_s1 + $0x338] sm:$0xff]  ;;  %v125_v19 = vld [vmem:[%s1345_s1 + $0x2c8] sm:$0xff]  ;;  %v794_v22 = vpack.c.bf16 %v107_v14, %v106_v13 }
  0x23   :  { %779 = vmatpush3.bf16.msra.mxu1 %v778_v37  ;;  %781 = vmatprep.subr.bf16.mxu0 %v780_v38  ;;  %v156_v20 = vld [vmem:[%s1345_s1 + $0x3c0] sm:$0xff]  ;;  %v157_v21 = vld [vmem:[%s1345_s1 + $0x3c8] sm:$0xff]  ;;  %v35_v25 = vld [vmem:[%s1344_s0 + $0x38] sm:$0xff]  ;;  %v826_v26 = vpack.c.bf16 %v139_v17, %v138_v15  ;;  %v796_v27 = vpack.c.bf16 %v125_v19, %v124_v18 }
  0x24   :  { %813 = vmatprep.subr.bf16.mxu1 %v812_v42  ;;  %v108_v23 = vld [vmem:[%s1345_s1 + $0x240] sm:$0xff]  ;;  %v33_v24 = vld [vmem:[%s1344_s0 + $0x28] sm:$0xff] }
  0x25   :  { %229 = vmatmul.mubr.f32.vlgmr.msra.gmra.mrb[0].mxu0 %v28_v48  ;;  %v109_v28 = vld [vmem:[%s1345_s1 + $0x248] sm:$0xff]  ;;  %v140_v29 = vld [vmem:[%s1345_s1 + $0x340] sm:$0xff] }
  0x26   :  { %299 = vmatmul.mubr.f32.vlgmr.msra.gmra.mrb[0].mxu1 %v30_v49  ;;  %783 = vmatpush3.bf16.msra.mxu0 %v782_v50 }
  0x27   :  { %815 = vmatpush3.bf16.msra.mxu1 %v814_v51  ;;  %785 = vmatprep.subr.bf16.mxu0 %v784_v52 }
  0x28   :  { %817 = vmatprep.subr.bf16.mxu1 %v816_v56 }
  0x2a   :  { %787 = vmatpush3.bf16.msra.mxu0 %v786_v62 }
  0x2b   :  { %819 = vmatpush3.bf16.msra.mxu1 %v818_v63  ;;  %789 = vmatprep.subr.bf16.mxu0 %v788_v0 }
  0x2c   :  { %821 = vmatprep.subr.bf16.mxu1 %v820_v4 }
  0x2e   :  { %791 = vmatpush3.bf16.msra.mxu0 %v790_v10 }
  0x2f   :  { %823 = vmatpush3.bf16.msra.mxu1 %v822_v11  ;;  %793 = vmatprep.subr.bf16.mxu0 %v792_v12 }
  0x30   :  { %10 = vsyncpa [#allocation4], 0  ;;  %825 = vmatprep.subr.bf16.mxu1 %v824_v16  ;;  %v828_v30 = vpack.c.bf16 %v157_v21, %v156_v20  ;;  %v141_v31 = vld [vmem:[%s1345_s1 + $0x348] sm:$0xff]  ;;  %v126_v32 = vld [vmem:[%s1345_s1 + $0x2d0] sm:$0xff]  ;;  %368 = vmatprep.mubr.f32.mxu0 %v33_v24  ;;  %v798_v36 = vpack.c.bf16 %v109_v28, %v108_v23  ;;  %vm25_vm0 = vcmask 261120   ;;  %v877_v8 = vmov 0.0  }
  0x31   :  { %v127_v33 = vld [vmem:[%s1345_s1 + $0x2d8] sm:$0xff]  ;;  %v158_v34 = vld [vmem:[%s1345_s1 + $0x3d0] sm:$0xff]  ;;  %438 = vmatprep.mubr.f32.mxu1 %v35_v25  ;;  %v830_v37 = vpack.c.bf16 %v141_v31, %v140_v29  ;;  %v128_v44 = vld [vmem:[%s1345_s1 + $0x2e0] sm:$0xff]  ;;  %26 = vst.msk [vmem:[#allocation2] sm:$0xff] %vm25_vm0, %v877_v8  ;;  %vm878_vm1 = vmmov 0   ;;  %v879_v10 = vmov 0  }
  0x32   :  { %v159_v35 = vld [vmem:[%s1345_s1 + $0x3d8] sm:$0xff]  ;;  %795 = vmatpush3.bf16.msra.mxu0 %v794_v22  ;;  %v800_v38 = vpack.c.bf16 %v127_v33, %v126_v32  ;;  %v110_v39 = vld [vmem:[%s1345_s1 + $0x250] sm:$0xff]  ;;  %v129_v45 = vld [vmem:[%s1345_s1 + $0x2e8] sm:$0xff]  ;;  %848 = vset.pattern.permute.xlu0 %v879_v10  ;;  %vm549_vm2 = vcmask 58368  }
  0x33   :  { %827 = vmatpush3.bf16.msra.mxu1 %v826_v26  ;;  %797 = vmatprep.subr.bf16.mxu0 %v796_v27  ;;  %v111_v40 = vld [vmem:[%s1345_s1 + $0x258] sm:$0xff]  ;;  %v142_v41 = vld [vmem:[%s1345_s1 + $0x350] sm:$0xff]  ;;  %v832_v42 = vpack.c.bf16 %v159_v35, %v158_v34  ;;  %v160_v46 = vld [vmem:[%s1345_s1 + $0x3e0] sm:$0xff]  ;;  %v804_v50 = vpack.c.bf16 %v129_v45, %v128_v44 }
  0x34   :  { %829 = vmatprep.subr.bf16.mxu1 %v828_v30  ;;  %v143_v43 = vld [vmem:[%s1345_s1 + $0x358] sm:$0xff]  ;;  %v161_v47 = vld [vmem:[%s1345_s1 + $0x3e8] sm:$0xff]  ;;  %v802_v48 = vpack.c.bf16 %v111_v40, %v110_v39  ;;  %v112_v51 = vld [vmem:[%s1345_s1 + $0x260] sm:$0xff] }
  0x35   :  { %v834_v49 = vpack.c.bf16 %v143_v43, %v142_v41  ;;  %v113_v52 = vld [vmem:[%s1345_s1 + $0x268] sm:$0xff]  ;;  %v144_v53 = vld [vmem:[%s1345_s1 + $0x360] sm:$0xff]  ;;  %v836_v54 = vpack.c.bf16 %v161_v47, %v160_v46  ;;  %v130_v56 = vld [vmem:[%s1345_s1 + $0x2f0] sm:$0xff] }
  0x36   :  { %799 = vmatpush3.bf16.msra.mxu0 %v798_v36  ;;  %v145_v55 = vld [vmem:[%s1345_s1 + $0x368] sm:$0xff]  ;;  %v131_v57 = vld [vmem:[%s1345_s1 + $0x2f8] sm:$0xff]  ;;  %v162_v58 = vld [vmem:[%s1345_s1 + $0x3f0] sm:$0xff]  ;;  %v806_v60 = vpack.c.bf16 %v113_v52, %v112_v51 }
  0x37   :  { %831 = vmatpush3.bf16.msra.mxu1 %v830_v37  ;;  %801 = vmatprep.subr.bf16.mxu0 %v800_v38  ;;  %v163_v59 = vld [vmem:[%s1345_s1 + $0x3f8] sm:$0xff]  ;;  %v838_v61 = vpack.c.bf16 %v145_v55, %v144_v53  ;;  %v808_v62 = vpack.c.bf16 %v131_v57, %v130_v56  ;;  %v114_v63 = vld [vmem:[%s1345_s1 + $0x270] sm:$0xff]  ;;  %v32_v6 = vld [vmem:[%s1344_s0 + $0x20] sm:$0xff] }
  0x38   :  { %833 = vmatprep.subr.bf16.mxu1 %v832_v42  ;;  %v115_v0 = vld [vmem:[%s1345_s1 + $0x278] sm:$0xff]  ;;  %v840_v1 = vpack.c.bf16 %v163_v59, %v162_v58  ;;  %v146_v2 = vld [vmem:[%s1345_s1 + $0x370] sm:$0xff]  ;;  %v461_v9 = vld [vmem:[%s1348_s4] sm:$0x3] }
  0x39   :  { %v147_v3 = vld [vmem:[%s1345_s1 + $0x378] sm:$0xff]  ;;  %v810_v4 = vpack.c.bf16 %v115_v0, %v114_v63  ;;  %v34_v7 = vld [vmem:[%s1344_s0 + $0x30] sm:$0xff]  ;;  %464 = vperm.xlu0 %848, %v461_v9   ;;  %v27_v25 = vld [vmem:[#allocation2] sm:$0xff] }
  0x3a   :  { %803 = vmatpush3.bf16.msra.mxu0 %v802_v48  ;;  %v842_v5 = vpack.c.bf16 %v147_v3, %v146_v2  ;;  %v565_v28 = vld [vmem:[%s1346_s2] ss:$0 sm:$0xff]  ;;  %s880_s2 = smov [#allocation3]  }
  0x3b   :  { %835 = vmatpush3.bf16.msra.mxu1 %v834_v49  ;;  %805 = vmatprep.subr.bf16.mxu0 %v804_v50  ;;  %v460_v32 = vld [vmem:[%s1347_s3] sm:$0x3]  ;;  %s557_s18 = sshll.u32 %s880_s2, 4  ;;  %s558_s18 = int_to_ptr.vmem [resolvable:$true] %s557_s18 }
  0x3c   :  { %837 = vmatprep.subr.bf16.mxu1 %v836_v54  ;;  %s853_s19 = scalar_lea.vmem %s558_s18, 32  ;;  %p858_p1 = scmp.lt.s32.totalorder %s558_s18, %s558_s18 }
  0x3d   :  { %p854_p0 = scmp.ne.s32.totalorder %s558_s18, %s853_s19  ;;  %p859_p2 = scmp.lt.s32.totalorder %s853_s19, %s853_s19 }
  0x3e   :  { %807 = vmatpush3.bf16.msra.mxu0 %v806_v60 }
  0x3f   :  { %839 = vmatpush3.bf16.msra.mxu1 %v838_v61  ;;  %809 = vmatprep.subr.bf16.mxu0 %v808_v62  ;;  %p860_p3 = por %p859_p2, %p858_p1 }
  0x40   :  { %841 = vmatprep.subr.bf16.mxu1 %v840_v1 }
  0x41   :  { %p861_p4 = pnand %p860_p3, %p854_p0 }
  0x42   :  { %811 = vmatpush3.bf16.msra.mxu0 %v810_v4 }
  0x43   :  { %843 = vmatpush3.bf16.msra.mxu1 %v842_v5  ;;  %711 = vmatprep.subr.mxu0 %v877_v8 }
  0x45   :  { %369 = vmatmul.mubr.f32.vlgmr.msra.gmra.mrb[2].mxu0 %v32_v6 }
  0x46   :  { %439 = vmatmul.mubr.f32.vlgmr.msra.gmra.mrb[2].mxu1 %v34_v7  ;;  %713 = vmatprep.mubr.msk.f32.mxu0 %vm878_vm1, %v877_v8 }
  0xb8   :  { %v465_v33 = vpop.permute.xlu0 %464 }
  0xf8   :  { %v601_v11 = vpop.f32.mrb[0].mxu0 }
  0xf9   :  { %v636_v12 = vpop.f32.mrb[0].mxu1  ;;  %v602_v13 = vpop.f32.mrb[1].mxu0 }
  0xfa   :  { %v603_v14 = vadd.f32 %v602_v13, %v601_v11  ;;  %v637_v15 = vpop.f32.mrb[1].mxu1 }
  0xfb   :  { %v638_v16 = vadd.f32 %v637_v15, %v636_v12 }
  0xfd   :  { %v301_v17 = vadd.f32 %v638_v16, %v603_v14 }
 0x118   :  { %v671_v18 = vpop.f32.mrb[2].mxu0 }
 0x119   :  { %v672_v19 = vpop.f32.mrb[3].mxu0  ;;  %v706_v20 = vpop.f32.mrb[2].mxu1 }
 0x11a   :  { %v673_v21 = vadd.f32 %v672_v19, %v671_v18  ;;  %v707_v22 = vpop.f32.mrb[3].mxu1 }
 0x11b   :  { %v708_v23 = vadd.f32 %v707_v22, %v706_v20 }
 0x11c   :  { %v371_v24 = vadd.f32 %v673_v21, %v301_v17 }
 0x11e   :  { %v441_v26 = vadd.f32 %v708_v23, %v371_v24 }
 0x120   :  { %v444_v27 = vadd.f32 %v441_v26, %v27_v25 }
 0x122   :  { %446 = vst.msk [vmem:[#allocation2] sm:$0xff] %vm25_vm0, %v444_v27 }
 0x129   :  { %v450_v29 = vld [vmem:[#allocation2] sm:$0xff] }
 0x12a   :  { %v458_v30 = vadd.f32 %v565_v28, %v450_v29 }
 0x12c   :  { %v459_v31 = vmax.f32 %v458_v30, 0.0 }
 0x12e   :  { %712 = vmatpush3.xpose.msk.msra.mxu0 %vm25_vm0, %v459_v31 }
 0x131   :  { %714 = vmatmul.mubr.msk.f32.vlgmr.msra.gmra.mrb[4].mxu0 %vm25_vm0, %v460_v32 }
 0x204   :  { %v539_v34 = vpop.f32.mrb[4].mxu0 }
 0x205   :  { %v540_v35 = vadd.f32 %v539_v34, %v465_v33  ;;  %v715_v36 = vpop.f32.mrb[5].mxu0 }
 0x207   :  { %v568_v37 = vmul.f32 -1.442695, %v540_v35 }
 0x209   :  { %849 = vpow2.f32 %v568_v37 }
 0x213   :  { %v850_v38 = vpop.eup %849 }
 0x214   :  { %v546_v39 = vadd.f32 1.0, %v850_v38 }
 0x216   :  { %851 = vrcp.f32 %v546_v39 }
 0x220   :  { %v852_v40 = vpop.eup %851 }
 0x221   :  { %550 = vst.msk [vmem:[#allocation3] sm:$0x3] %vm549_vm2, %v852_v40 }
 0x222   :  { %864 = shalt.err (!%p861_p4)
}
 0x223   :  { %s865_s21 = scalar_lea.hbm %s1349_s5, 32 }
 0x224   :  { %p866_p5 = scmp.ne.s32.totalorder %s1349_s5, %s865_s21  ;;  %p869_p6 = scmp.lt.u32.totalorder %s865_s21, %s1349_s5 }
 0x226   :  { %p871_p7 = pnand %p869_p6, %p866_p5 }
 0x228   :  { %874 = shalt.err (!%p871_p7)
}
 0x229   :  { %560 = dma.vmem_to_hbm [thread:$0]  %s558_s18, 32, %s1349_s5, [#allocation4]  }
 0x22a   :  { %875 = dma.done.wait [#allocation4], 32  }
 0x22b   :  { %876 = vsyncadd [#allocation4], 4294967264 }
 0x22c   :  { %564 = vsyncpa [#allocation4], 1 }

</bundles_post_ra>
